<compile_context>
chip_gen: v6e
topology: v6e:2x2x1
jax: 0.10.0
libtpu: 0.0.40
codegen_flags: <defaults>
</compile_context>

<pallas_src>
import functools

import jax
import jax.numpy as jnp
from jax import lax
from jax.experimental import pallas as pl
from jax.experimental.pallas import tpu as pltpu


def _round_up(a, m):
    return ((a + m - 1) // m) * m


def _squash(u, g, approx):
    # per-capsule squared norm broadcast to every column of the group (MXU matmul
    # against a block-diagonal ones matrix -> no lane-splitting reshape)
    sq = jnp.dot(u * u, g, preferred_element_type=jnp.float32)
    inv_norm = lax.rsqrt(sq + 1e-8)                       # EUP slot
    return u * (sq * inv_norm) * pl.reciprocal(1.0 + sq, approx=approx)


def _single_k_kernel(p_ref, w_ref, b_ref, g_ref, o_ref, *, approx):
    # p_ref: (tm, Kd) patches, w_ref: (Kd, Np) weights, b_ref: (1, Np), g_ref: (Np, Np)
    u = jnp.dot(p_ref[...], w_ref[...], preferred_element_type=jnp.float32) + b_ref[...]
    o_ref[...] = _squash(u, g_ref[...], approx).astype(o_ref.dtype)


def _multi_k_kernel(p_ref, w_ref, b_ref, g_ref, o_ref, acc_ref, *, approx):
    k = pl.program_id(1)

    @pl.when(k == 0)
    def _init():
        acc_ref[...] = jnp.zeros_like(acc_ref)

    acc_ref[...] += jnp.dot(p_ref[...], w_ref[...], preferred_element_type=jnp.float32)

    @pl.when(k == pl.num_programs(1) - 1)
    def _finalize():
        u = acc_ref[...] + b_ref[...]
        o_ref[...] = _squash(u, g_ref[...], approx).astype(o_ref.dtype)


def _vmem_plan():
    """Generation-aware (budget, vmem_limit_bytes) for tile sizing."""
    phys = 64 * 1024 * 1024
    try:
        info = pltpu.get_tpu_info()
        phys = int(getattr(info, "vmem_capacity_bytes", phys))
    except Exception:
        pass
    if phys >= 100 * 1024 * 1024:            # v5e / v6e: 128 MiB physical VMEM
        return 96 * 1024 * 1024, 110 * 1024 * 1024
    return 40 * 1024 * 1024, 48 * 1024 * 1024  # v7x: 64 MiB physical VMEM


def primary_caps_pallas(x, w_stack, b_stack, stride=2, *,
                        compute_dtype=jnp.bfloat16,
                        out_dtype=None,
                        block_k=1024,
                        max_single_k=4096,
                        transpose_output=True):
    """x: (B, C, H, W); w_stack: (OC, D, C, K, K); b_stack: (OC, D).

    Returns (B, OC, H', W', D) (PyTorch layout) by default; pass
    transpose_output=False to get (B, H', W', OC, D) and skip the extra HBM
    permute pass when the consumer can take that layout directly.
    """
    B, C, H, W = x.shape
    OC, D, Cw, K, Kw = w_stack.shape
    assert C == Cw and K == Kw
    Hout = (H - K) // stride + 1
    Wout = (W - K) // stride + 1

    M = B * Hout * Wout
    Kd = C * K * K
    N = OC * D

    in_bytes = jnp.dtype(compute_dtype).itemsize
    if out_dtype is None:
        out_dtype = jnp.float32 if compute_dtype == jnp.float32 else compute_dtype
    out_bytes = jnp.dtype(out_dtype).itemsize
    approx_recip = compute_dtype != jnp.float32     # keep exact recip on the f32 path

    n_pad = _round_up(N, 128)                       # lane-dense output / MXU N dim
    budget, vmem_limit = _vmem_plan()

    single_k = Kd <= max_single_k
    if single_k:
        # Full-extent reduction block (block dim == array dim is legal) -> no Kd padding.
        kd_eff, tk, grid_k = Kd, Kd, 1
        fixed = (2 * Kd * n_pad * in_bytes          # double-buffered weight block
                 + 2 * n_pad * n_pad * 4            # group matrix
                 + 2 * 8 * n_pad * 4)               # bias (padded to 8 sublanes)
        per_row = 2 * Kd * in_bytes + 2 * n_pad * out_bytes + 4 * n_pad * 4
    else:
        # Pad Kd only to a multiple of 128; tk = largest 128-multiple divisor <= block_k.
        kd_eff = _round_up(Kd, 128)
        q = kd_eff // 128
        best = 1
        for d in range(1, q + 1):
            if q % d == 0 and 128 * d <= block_k:
                best = d
        tk = 128 * best
        grid_k = kd_eff // tk
        fixed = (2 * tk * n_pad * in_bytes
                 + 2 * n_pad * n_pad * 4
                 + 2 * 8 * n_pad * 4)
        per_row = 2 * tk * in_bytes + 2 * n_pad * out_bytes + 5 * n_pad * 4

    # ---- M tile from the generation-aware VMEM budget ----
    tm = int(min(1024, _round_up(M, 8), max(8, (budget - fixed) // per_row)))
    if M > 8:
        # >= 2 M tiles so both v7x TensorCores get work on the "parallel" axis
        tm = min(tm, _round_up(-(-M // 2), 8))
    for align in (256, 128, 8):                      # MXU-tile alignment
        if tm >= align:
            tm = (tm // align) * align
            break
    tm = max(8, tm)
    m_pad = _round_up(M, tm)
    grid_m = m_pad // tm

    # ---- wrapper glue (plain JAX, no gather) ----
    xc = x.astype(compute_dtype)
    # Identity grouped conv; output channel index = c*K*K + kh*K + kw, emitted NHWC so
    # the (M, Kd) reshape is layout-free.
    patches = lax.conv_general_dilated_patches(
        xc, filter_shape=(K, K), window_strides=(stride, stride), padding="VALID",
        dimension_numbers=("NCHW", "OIHW", "NHWC"))
    patches = patches.reshape(M, Kd)
    if m_pad > M or kd_eff > Kd:
        patches = jnp.pad(patches, ((0, m_pad - M), (0, kd_eff - Kd)))

    # weights: (OC, D, C, K, K) -> (Kd, N), Kd ordered (c, kh, kw), column = oc*D + d
    w_mat = w_stack.transpose(2, 3, 4, 0, 1).reshape(Kd, N).astype(compute_dtype)
    w_mat = jnp.pad(w_mat, ((0, kd_eff - Kd), (0, n_pad - N)))
    b_vec = jnp.pad(b_stack.reshape(1, N).astype(jnp.float32), ((0, 0), (0, n_pad - N)))

    # block-diagonal ones matrix: 1 where two (real) columns share a capsule group
    group = jnp.concatenate([jnp.repeat(jnp.arange(OC), D),
                             jnp.full((n_pad - N,), -1, jnp.int32)])
    g_mat = ((group[:, None] == group[None, :]) & (group[:, None] >= 0)
             ).astype(jnp.float32)

    cost = pl.CostEstimate(
        flops=2 * m_pad * kd_eff * n_pad + 2 * m_pad * n_pad * n_pad + 8 * m_pad * n_pad,
        transcendentals=2 * m_pad * n_pad,
        bytes_accessed=(in_bytes * (m_pad * kd_eff + grid_m * kd_eff * n_pad)
                        + out_bytes * m_pad * n_pad
                        + 4 * grid_m * (n_pad * n_pad + n_pad)),
    )

    if single_k:
        kernel = functools.partial(_single_k_kernel, approx=approx_recip)
        grid_spec = pltpu.PrefetchScalarGridSpec(
            num_scalar_prefetch=0,
            grid=(grid_m,),
            in_specs=[
                pl.BlockSpec((tm, Kd), lambda i: (i, 0)),        # patches
                pl.BlockSpec((Kd, n_pad), lambda i: (0, 0)),     # weights (DMA'd once)
                pl.BlockSpec((1, n_pad), lambda i: (0, 0)),      # bias
                pl.BlockSpec((n_pad, n_pad), lambda i: (0, 0)),  # group matrix
            ],
            out_specs=pl.BlockSpec((tm, n_pad), lambda i: (i, 0)),
        )
        dim_sem = ("parallel",)
    else:
        kernel = functools.partial(_multi_k_kernel, approx=approx_recip)
        grid_spec = pltpu.PrefetchScalarGridSpec(
            num_scalar_prefetch=0,
            grid=(grid_m, grid_k),
            in_specs=[
                pl.BlockSpec((tm, tk), lambda i, k: (i, k)),        # patches
                pl.BlockSpec((tk, n_pad), lambda i, k: (k, 0)),     # weights
                pl.BlockSpec((1, n_pad), lambda i, k: (0, 0)),      # bias
                pl.BlockSpec((n_pad, n_pad), lambda i, k: (0, 0)),  # group matrix
            ],
            out_specs=pl.BlockSpec((tm, n_pad), lambda i, k: (i, 0)),
            scratch_shapes=[pltpu.VMEM((tm, n_pad), jnp.float32)],
        )
        dim_sem = ("parallel", "arbitrary")

    out_flat = pl.pallas_call(
        kernel,
        out_shape=jax.ShapeDtypeStruct((m_pad, n_pad), out_dtype),
        grid_spec=grid_spec,
        compiler_params=pltpu.CompilerParams(
            dimension_semantics=dim_sem,
            vmem_limit_bytes=vmem_limit,
        ),
        cost_estimate=cost,
    )(patches, w_mat, b_vec, g_mat)

    # (M, N) -> (B, H', W', OC, D) [-> (B, OC, H', W', D) if requested]
    out = out_flat[:M, :N].reshape(B, Hout, Wout, OC, D)
    if transpose_output:
        out = out.transpose(0, 3, 1, 2, 4)
    return out


def primary_caps_reference(x, w_stack, b_stack, stride=2):
    """Pure-JAX reference mirroring the PyTorch forward exactly."""
    OC = w_stack.shape[0]
    us = []
    for i in range(OC):
        y = lax.conv_general_dilated(
            x, w_stack[i],
            window_strides=(stride, stride), padding="VALID",
            dimension_numbers=("NCHW", "OIHW", "NCHW"),
        ) + b_stack[i][None, :, None, None]
        us.append(y)
    u = jnp.stack(us, axis=1)                 # (B, OC, D, H', W')
    u = u.transpose(0, 1, 3, 4, 2)            # (B, OC, H', W', D)
    sq = jnp.sum(u ** 2, axis=-1, keepdims=True)
    return sq * u / ((1.0 + sq) * jnp.sqrt(sq + 1e-8))


if __name__ == "__main__":
    # Small, consistent shapes: batch=2, in_channels=16, 9x9 spatial,
    # cap_dim=8, out_channels(num capsule convs)=4, kernel=3, stride=2 -> 4x4 spatial out.
    B, C, H, W = 2, 16, 9, 9
    cap_dim, out_channels, K = 8, 4, 3

    key = jax.random.PRNGKey(0)
    kx, kw, kb = jax.random.split(key, 3)
    x = jax.random.normal(kx, (B, C, H, W), dtype=jnp.float32)
    # deterministic parameter init (synthetic, not a checkpoint load)
    w_stack = 0.05 * jax.random.normal(kw, (out_channels, cap_dim, C, K, K), dtype=jnp.float32)
    b_stack = 0.01 * jax.random.normal(kb, (out_channels, cap_dim), dtype=jnp.float32)

    ref = primary_caps_reference(x, w_stack, b_stack)
    Hout = (H - K) // 2 + 1
    Wout = (W - K) // 2 + 1

    # f32, single-K-block path (tight numerical validation)
    out_f32 = jax.block_until_ready(
        primary_caps_pallas(x, w_stack, b_stack, compute_dtype=jnp.float32))
    # bf16-fed MXU path with bf16 output (default production path)
    out_bf16 = jax.block_until_ready(
        primary_caps_pallas(x, w_stack, b_stack, compute_dtype=jnp.bfloat16))
    # forced multi-K path (exercises the accumulator / pl.when kernel used at canonical Kd)
    out_mk = jax.block_until_ready(
        primary_caps_pallas(x, w_stack, b_stack, compute_dtype=jnp.float32,
                            max_single_k=0, block_k=128))

    assert out_f32.shape == (B, out_channels, Hout, Wout, cap_dim)
    assert out_bf16.shape == (B, out_channels, Hout, Wout, cap_dim)
    assert out_mk.shape == (B, out_channels, Hout, Wout, cap_dim)
    assert jnp.allclose(out_f32, ref, atol=1e-4, rtol=1e-4), "f32 mismatch vs reference"
    assert jnp.allclose(out_mk, ref, atol=1e-4, rtol=1e-4), "multi-K mismatch vs reference"
    assert jnp.allclose(out_bf16.astype(jnp.float32), ref, atol=3e-2, rtol=3e-2), \
        "bf16 mismatch vs reference"

    print("KERNEL_OK")
</pallas_src>

<mosaic_0001>
module attributes {stable_mosaic.version = 11 : i64} {
  func.func @_single_k_kernel(%arg0: i32, %arg1: memref<16x144xf32, #tpu.memory_space<vmem>>, %arg2: memref<144x128xf32, #tpu.memory_space<vmem>>, %arg3: memref<1x128xf32, #tpu.memory_space<vmem>>, %arg4: memref<128x128xf32, #tpu.memory_space<vmem>>, %arg5: memref<16x128xf32, #tpu.memory_space<vmem>>) attributes {dimension_semantics = [#tpu.dimension_semantics<parallel>], iteration_bounds = array<i64: 2>, scalar_prefetch = 0 : i64, scratch_operands = 0 : i64, tpu.core_type = #tpu.core_type<tc>, window_params = [{transform_indices = @transform_0, window_bounds = array<i64: 16, 144>}, {pipeline_mode = #tpu.pipeline_mode<synchronous>, transform_indices = @transform_1, window_bounds = array<i64: 144, 128>}, {pipeline_mode = #tpu.pipeline_mode<synchronous>, transform_indices = @transform_2, window_bounds = array<i64: 1, 128>}, {pipeline_mode = #tpu.pipeline_mode<synchronous>, transform_indices = @transform_3, window_bounds = array<i64: 128, 128>}, {transform_indices = @transform_4, window_bounds = array<i64: 16, 128>}]} {
    %c0 = arith.constant 0 : index
    %c0_0 = arith.constant 0 : index
    %0 = vector.load %arg1[%c0, %c0_0] : memref<16x144xf32, #tpu.memory_space<vmem>>, vector<16x144xf32>
    %c0_1 = arith.constant 0 : index
    %c0_2 = arith.constant 0 : index
    %1 = vector.load %arg2[%c0_1, %c0_2] : memref<144x128xf32, #tpu.memory_space<vmem>>, vector<144x128xf32>
    %cst = arith.constant dense<0.000000e+00> : vector<16x128xf32>
    %2 = tpu.matmul %0, %1, %cst {dimension_numbers = #tpu.dot_dimension_numbers<[1], [0], [0], [1], [0, 0, 1, 1], [], []>} : vector<16x144xf32>, vector<144x128xf32>, vector<16x128xf32> -> vector<16x128xf32>
    %c0_3 = arith.constant 0 : index
    %c0_4 = arith.constant 0 : index
    %3 = vector.load %arg3[%c0_3, %c0_4] : memref<1x128xf32, #tpu.memory_space<vmem>>, vector<1x128xf32>
    %4 = vector.broadcast %3 : vector<1x128xf32> to vector<16x128xf32>
    %5 = arith.addf %2, %4 : vector<16x128xf32>
    %c0_5 = arith.constant 0 : index
    %c0_6 = arith.constant 0 : index
    %6 = vector.load %arg4[%c0_5, %c0_6] : memref<128x128xf32, #tpu.memory_space<vmem>>, vector<128x128xf32>
    %7 = arith.mulf %5, %5 : vector<16x128xf32>
    %cst_7 = arith.constant dense<0.000000e+00> : vector<16x128xf32>
    %8 = tpu.matmul %7, %6, %cst_7 {dimension_numbers = #tpu.dot_dimension_numbers<[1], [0], [0], [1], [0, 0, 1, 1], [], []>} : vector<16x128xf32>, vector<128x128xf32>, vector<16x128xf32> -> vector<16x128xf32>
    %cst_8 = arith.constant 9.99999993E-9 : f32
    %9 = vector.broadcast %cst_8 : f32 to vector<16x128xf32>
    %10 = arith.addf %8, %9 : vector<16x128xf32>
    %11 = math.rsqrt %10 : vector<16x128xf32>
    %12 = arith.mulf %8, %11 : vector<16x128xf32>
    %13 = arith.mulf %5, %12 : vector<16x128xf32>
    %cst_9 = arith.constant 1.000000e+00 : f32
    %14 = vector.broadcast %cst_9 : f32 to vector<16x128xf32>
    %15 = arith.addf %14, %8 : vector<16x128xf32>
    %16 = tpu.reciprocal %15 : vector<16x128xf32> -> vector<16x128xf32>
    %17 = arith.mulf %13, %16 : vector<16x128xf32>
    %c0_10 = arith.constant 0 : index
    %c0_11 = arith.constant 0 : index
    %18 = vector.load %arg5[%c0_10, %c0_11] : memref<16x128xf32, #tpu.memory_space<vmem>>, vector<16x128xf32>
    tpu.vector_store %arg5[%c0_10, %c0_11], %17 {strides = array<i32>} : memref<16x128xf32, #tpu.memory_space<vmem>>, vector<16x128xf32>,
    return
  }
  func.func @transform_0(%arg0: i32) -> (i32, i32) {
    %c0_i32 = arith.constant 0 : i32
    %c0_i32_0 = arith.constant 0 : i32
    return %arg0, %c0_i32 : i32, i32
  }
  func.func @transform_1(%arg0: i32) -> (i32, i32) {
    %c0_i32 = arith.constant 0 : i32
    %c0_i32_0 = arith.constant 0 : i32
    %c0_i32_1 = arith.constant 0 : i32
    return %c0_i32, %c0_i32_0 : i32, i32
  }
  func.func @transform_2(%arg0: i32) -> (i32, i32) {
    %c0_i32 = arith.constant 0 : i32
    %c0_i32_0 = arith.constant 0 : i32
    %c0_i32_1 = arith.constant 0 : i32
    return %c0_i32, %c0_i32_0 : i32, i32
  }
  func.func @transform_3(%arg0: i32) -> (i32, i32) {
    %c0_i32 = arith.constant 0 : i32
    %c0_i32_0 = arith.constant 0 : i32
    %c0_i32_1 = arith.constant 0 : i32
    return %c0_i32, %c0_i32_0 : i32, i32
  }
  func.func @transform_4(%arg0: i32) -> (i32, i32) {
    %c0_i32 = arith.constant 0 : i32
    %c0_i32_0 = arith.constant 0 : i32
    return %arg0, %c0_i32 : i32, i32
  }
}

</mosaic_0001>

<bundles_post_ra>
// kernel: tpu_custom_call.1
= control target key start
LH: loop header
LB: loop body
LE: loop exit
PB: predicated region body
PF: predicated region fallthrough
CT: control target
= control target key end

     0   :  { %9 = vsyncpa [#allocation3], 0  ;;  %s1138_s0 = inlined_call_operand.hbm [shape: f32[32,144], index: 0, kind: input, shape index: {}]   ;;  %s1139_s1 = inlined_call_operand.hbm [shape: f32[144,128], index: 1, kind: input, shape index: {}]   ;;  %s1140_s2 = inlined_call_operand.vmem [shape: f32[1,128], index: 2, kind: input, shape index: {}]   ;;  %s1141_s3 = inlined_call_operand.hbm [shape: f32[128,128], index: 3, kind: input, shape index: {}]   ;;  %s1142_s4 = inlined_call_operand.hbm [shape: f32[32,128], index: 4, kind: output, shape index: {}]  }
   0x1   :  { %11 = vsyncpa [#allocation3 + $0x1], 0 }
   0x2   :  { %12 = vsyncpa [#allocation6], 0 }
   0x3   :  { %13 = vsyncpa [#allocation4], 0 }
   0x4   :  { %15 = vsyncpa [#allocation4 + $0x1], 0  ;;  %s920_s15 = smov 0   ;;  %s922_s16 = smov 0  }
   0x5   :  { %s924_s17 = smov 0   ;;  %s926_s18 = smov 0  }
   0x6 LB: > { %s941_s19 = sadd.s32 4294967295, %s882_s18   ;;  %s574_s20 = sadd.s32 4294967294, %s882_s18   ;;  %s882_s18 = sphi %s926_s18, %s1164_s18   ;;  %s878_s17 = sphi %s924_s17, %s1163_s17   ;;  %s874_s16 = sphi %s922_s16, %s1162_s16   ;;  %s870_s15 = sphi %s920_s15, %s1161_s15  }
   0x7   : > { %p41_p0 = scmp.ne.s32.totalorder %s874_s16, %s870_s15  ;;  %p1143_p1 = scmp.eq.s32.totalorder %s941_s19, 0 }
   0x8   : > { %p134_p3 = scmp.eq.s32.totalorder %s574_s20, 1  ;;  %p575_p5 = scmp.ge.s32.totalorder %s882_s18, 1 }
   0x9   : > { %p950_p4 = por %p1143_p1, %p41_p0  ;;  %p141_p7 = scmp.lt.s32.totalorder %s882_s18, 3 }
   0xa   : > { %p955_p6 = por %p134_p3, %p41_p0  ;;  %s884_s24 = smov [#allocation5]  }
   0xb   : > { %s1147_s21 = scalar_select %p950_p4, 1, 0 }
   0xc   : > { %s1148_s22 = scalar_select %p955_p6, 1, 0 }
   0xd   : > { %p960_p8 = pnand %p575_p5, %p141_p7  ;;  %s153_s25 = sshll.u32 %s884_s24, 4  ;;  %s154_s25 = int_to_ptr.vmem [resolvable:$true] %s153_s25 }
   0xe   : > { %s885_s27 = smov [#allocation7]   ;;  %s745_s29 = scalar_lea.vmem %s154_s25, 2304 }
   0xf   : > { %s1149_s23 = scalar_select %p960_p8, 1, 0 }
  0x10   : > { %p664_p9 = pneg %p960_p8  ;;  %s169_s28 = sshll.u32 %s885_s27, 4  ;;  %s170_s28 = int_to_ptr.vmem [resolvable:$true] %s169_s28 }
  0x11   : > { %p746_p13 = scmp.ne.s32.totalorder %s154_s25, %s745_s29  ;;  %p753_p5 = scmp.lt.s32.totalorder %s154_s25, %s154_s25 }
  0x12   : > { %p969_p11 = pnand %p664_p9, %p1143_p1  ;;  %p754_p7 = scmp.lt.s32.totalorder %s745_s29, %s745_s29 }
  0x14   : > { %p736_p12 = pneg %p969_p11  ;;  %p755_p10 = por %p754_p7, %p753_p5 }
  0x16   : > { %p748_p0 = pnand %p746_p13, %p736_p12 }
  0x18   : > { %p749_p3 = pneg %p748_p0 }
  0x1a   : > { %p756_p9 = pnand %p755_p10, %p749_p3 }
  0x1c   : > { %759 = shalt.err (!%p756_p9)
}
  0x1d   : > { %s886_s30 = smov 128   ;;  %s887_s5 = smov 8  }
  0x1e   : > { %667 = dma.hbm_to_vmem [thread:$0]  (!%p969_p11), %s1139_s1, 2304, %s154_s25, [#allocation6], %s886_s30, %s886_s30, %s887_s5  }
  0x1f   : > { %s771_s8 = scalar_lea.vmem %s170_s28, 2048  ;;  %p779_p2 = scmp.lt.s32.totalorder %s170_s28, %s170_s28 }
  0x20   : > { %p772_p1 = scmp.ne.s32.totalorder %s170_s28, %s771_s8  ;;  %p780_p6 = scmp.lt.s32.totalorder %s771_s8, %s771_s8 }
  0x22   : > { %p774_p13 = pnand %p772_p1, %p736_p12  ;;  %p781_p5 = por %p780_p6, %p779_p2 }
  0x24   : > { %p775_p0 = pneg %p774_p13 }
  0x26   : > { %p782_p10 = pnand %p781_p5, %p775_p0 }
  0x28   : > { %785 = shalt.err (!%p782_p10)
}
  0x29   : > { %670 = dma.hbm_to_vmem [thread:$0]  (!%p969_p11), %s1141_s3, 2048, %s170_s28, [#allocation6], %s886_s30, %s886_s30, %s887_s5  }
  0x2a   : > { %s992_s11 = sadd.s32 1, %s882_s18   ;;  %s28_s12 = sadd.s32 1, %s878_s17 }
  0x2b   : > { %s25_s13 = ssub.s32 %s882_s18, %s992_s11  ;;  %p35_p1 = scmp.ne.s32.totalorder %s878_s17, %s874_s16 }
  0x2c   : > { %p26_p2 = scmp.eq.s32.totalorder %s25_s13, 0  ;;  %p36_p6 = scmp.eq.s32.totalorder %s882_s18, 0 }
  0x2d   : > { %p1151_p12 = scmp.eq.s32.totalorder %s941_s19, 1  ;;  %p681_p7 = scmp.lt.s32.totalorder %s882_s18, 2 }
  0x2e   : > { %s1008_s20 = scalar_select %p26_p2, %s878_s17, %s28_s12  }
  0x2f   : > { %p1002_p3 = por %p1151_p12, %p35_p1  ;;  %p37_p9 = por %p36_p6, %p35_p1 }
  0x30   : > { %s183_s24 = sand.u32 1, %s878_s17   ;;  %s597_s26 = sshll.u32 %s882_s18, 9 }
  0x31   : > { %s1152_s14 = scalar_select %p1002_p3, 1, 0 }
  0x32   : > { %s579_s25 = sshll.u32 %s183_s24, 5  ;;  %s1015_s29 = scalar_lea.hbm %s1138_s0, %s597_s26 }
  0x33   : > { %s187_s30 = scalar_lea.vmem [#allocation2], %s579_s25  ;;  %p1019_p11 = pnand %p681_p7, %p37_p9 }
  0x34   : > { %s195_s5 = sshll.u32 %s187_s30, 4  ;;  %s1023_s7 = scalar_lea.sflag [#allocation3], %s183_s24  ;;  %s1017_s5 = int_to_ptr.vmem [resolvable:$true] %s195_s5 }
  0x35   : > { %s786_s8 = scalar_lea.hbm %s1015_s29, 512  ;;  %p788_p0 = pneg %p1019_p11 }
  0x36   : > { %p787_p13 = scmp.ne.s32.totalorder %s1015_s29, %s786_s8  ;;  %s791_s12 = scalar_lea.hbm %s1138_s0, 1024 }
  0x37   : > { %p792_p1 = scmp.lt.s32.totalorder %s1015_s29, %s1138_s0  ;;  %p793_p2 = scmp.lt.s32.totalorder %s791_s12, %s786_s8 }
  0x38   : > { %p789_p5 = pnand %p788_p0, %p787_p13 }
  0x39   : > { %p794_p6 = por %p793_p2, %p792_p1 }
  0x3a   : > { %p790_p10 = pneg %p789_p5 }
  0x3c   : > { %p795_p12 = pnand %p794_p6, %p790_p10 }
  0x3e   : > { %798 = shalt.err (!%p795_p12)
}
  0x3f   : > { %s799_s24 = scalar_lea.vmem %s1017_s5, 512  ;;  %s888_s26 = smov [#allocation2]  }
  0x40   : > { %p800_p7 = scmp.ne.s32.totalorder %s1017_s5, %s799_s24  ;;  %s804_s27 = sshll.u32 %s888_s26, 4  ;;  %s805_s27 = int_to_ptr.vmem [resolvable:$false] %s804_s27 }
  0x41   : > { %s806_s28 = scalar_lea.vmem %s805_s27, 1024  ;;  %p807_p5 = scmp.lt.s32.totalorder %s1017_s5, %s805_s27 }
  0x42   : > { %p802_p9 = pnand %p800_p7, %p788_p0  ;;  %p808_p3 = scmp.lt.s32.totalorder %s806_s28, %s799_s24 }
  0x44   : > { %p803_p13 = pneg %p802_p9  ;;  %p809_p4 = por %p808_p3, %p807_p5 }
  0x46   : > { %p810_p8 = pnand %p809_p4, %p803_p13 }
  0x48   : > { %813 = shalt.err (!%p810_p8)
}
  0x49   : > { %s889_s30 = smov 256   ;;  %s890_s8 = smov 16  }
  0x4a   : > { %674 = dma.hbm_to_vmem [thread:$0]  (!%p1019_p11), %s1015_s29, 512, %s1017_s5, %s1023_s7, %s889_s30, %s889_s30, %s890_s8  }
  0x4b   : > { %p1154_p0 = scmp.ne.s32.totalorder %s1149_s23, 0 }
  0x4c   : > { %s1047_s9 = sand.u32 (!%p1154_p0), 1, %s874_s16   ;;  %p1155_p4 = scmp.ne.s32.totalorder (!%p1154_p0), %s1147_s21, 0 }
  0x4d   : > { %207 = sbr.rel (%p1154_p0) target bundleno = 555 (0x22b), region = 36  ;;  %s584_s10 = sshll.u32 (!%p1154_p0), %s1047_s9, 5 }
  0x4e   : > { %s210_s12 = scalar_lea.sflag (!%p1154_p0), [#allocation3], %s1047_s9  ;;  %s1051_s13 = scalar_lea.vmem (!%p1154_p0), [#allocation2], %s584_s10 }
  0x52   : > { %857 = dma.done.wait (%p1155_p4), %s210_s12, 512  }
  0x53   : > { %859 = vsyncadd (%p1155_p4), %s210_s12, 4294966784  ;;  %p1156_p8 = scmp.eq.s32.totalorder %s941_s19, 0 }
  0x55   : > { %861 = dma.done.wait (%p1156_p8), [#allocation6], 4352   ;;  %p1157_p3 = pmov %p1156_p8 }
  0x56   : > { %v891_v0 = vmov 0.0   ;;  %v267_v1 = vld [vmem:[#allocation5 + $0x78] sm:$0xff]  ;;  %v266_v2 = vld [vmem:[#allocation5 + $0x70] sm:$0xff]  ;;  %v265_v3 = vld [vmem:[#allocation5 + $0x68] sm:$0xff]  ;;  %vm277_vm0 = vcmask 130048   ;;  %s587_s29 = sshll.u32 %s1047_s9, 4 }
  0x57   : > { %863 = vsyncadd (%p1157_p3), [#allocation6], 4294962944  ;;  %284 = vmatprep.subr.mxu0 %v891_v0  ;;  %v264_v4 = vld [vmem:[#allocation5 + $0x60] sm:$0xff]  ;;  %v263_v5 = vld [vmem:[#allocation5 + $0x58] sm:$0xff]  ;;  %s598_s5 = sshll.u32 %s941_s19, 8  ;;  %s245_s6 = scalar_lea.vmem [#allocation8], %s587_s29 }
  0x58   : > { %285 = vmatpush1.msra.mxu0 %v267_v1  ;;  %v249_v6 = vld [vmem:[%s1051_s13 + $0x8] sm:$0xff]  ;;  %v373_v8 = vld [vmem:[#allocation7 + $0x70] sm:$0xff]  ;;  %v262_v9 = vld [vmem:[#allocation5 + $0x50] sm:$0xff]  ;;  %s482_s7 = sshll.u32 %s245_s6, 4  ;;  %s1093_s26 = scalar_lea.hbm %s1142_s4, %s598_s5  ;;  %s1095_s7 = int_to_ptr.vmem [resolvable:$true] %s482_s7 }
  0x59   : > { %286 = vmatprep.subr.mxu0 %v891_v0  ;;  %589 = vmatprep.mubr.msk.f32.mxu0 %vm277_vm0, %v249_v6  ;;  %v374_v7 = vld [vmem:[#allocation7 + $0x78] sm:$0xff]  ;;  %v372_v10 = vld [vmem:[#allocation7 + $0x68] sm:$0xff]  ;;  %v371_v12 = vld [vmem:[#allocation7 + $0x60] sm:$0xff]  ;;  %s469_s19 = scalar_lea.sflag [#allocation4], %s1047_s9  ;;  %s814_s27 = scalar_lea.vmem %s1095_s7, 256 }
  0x5a   : > { %287 = vmatpush1.msra.mxu0 %v266_v2  ;;  %617 = vmatprep.subr.mxu1 %v374_v7  ;;  %v261_v11 = vld [vmem:[#allocation5 + $0x48] sm:$0xff]  ;;  %v260_v13 = vld [vmem:[#allocation5 + $0x40] sm:$0xff]  ;;  %v259_v15 = vld [vmem:[#allocation5 + $0x38] sm:$0xff]  ;;  %p815_p11 = scmp.ne.s32.totalorder %s1095_s7, %s814_s27  ;;  %p1158_p10 = scmp.ne.s32.totalorder %s1152_s14, 0 }
  0x5b   : > { %288 = vmatprep.subr.mxu0 %v891_v0  ;;  %618 = vmatpush3.msra.mxu1 %v374_v7  ;;  %v370_v14 = vld [vmem:[#allocation7 + $0x58] sm:$0xff]  ;;  %v369_v16 = vld [vmem:[#allocation7 + $0x50] sm:$0xff]  ;;  %v258_v17 = vld [vmem:[#allocation5 + $0x30] sm:$0xff]  ;;  %s892_s28 = smov [#allocation8]  }
  0x5c   : > { %289 = vmatpush1.msra.mxu0 %v265_v3  ;;  %619 = vmatprep.subr.mxu1 %v373_v8  ;;  %v368_v18 = vld [vmem:[#allocation7 + $0x48] sm:$0xff]  ;;  %v257_v19 = vld [vmem:[#allocation5 + $0x28] sm:$0xff]  ;;  %v367_v20 = vld [vmem:[#allocation7 + $0x40] sm:$0xff]  ;;  %p816_p1 = pnand %p815_p11, %p1158_p10  ;;  %s818_s30 = sshll.u32 %s892_s28, 4  ;;  %s819_s30 = int_to_ptr.vmem [resolvable:$false] %s818_s30 }
  0x5d   : > { %290 = vmatprep.subr.mxu0 %v891_v0  ;;  %620 = vmatpush3.msra.mxu1 %v373_v8  ;;  %v256_v21 = vld [vmem:[#allocation5 + $0x20] sm:$0xff]  ;;  %v366_v22 = vld [vmem:[#allocation7 + $0x38] sm:$0xff]  ;;  %v255_v23 = vld [vmem:[#allocation5 + $0x18] sm:$0xff]  ;;  %s820_s8 = scalar_lea.vmem %s819_s30, 512  ;;  %p821_p6 = scmp.lt.s32.totalorder %s1095_s7, %s819_s30 }
  0x5e   : > { %291 = vmatpush1.msra.mxu0 %v264_v4  ;;  %621 = vmatprep.subr.mxu1 %v372_v10  ;;  %v365_v24 = vld [vmem:[#allocation7 + $0x30] sm:$0xff]  ;;  %v254_v25 = vld [vmem:[#allocation5 + $0x10] sm:$0xff]  ;;  %v364_v26 = vld [vmem:[#allocation7 + $0x28] sm:$0xff]  ;;  %p817_p2 = pneg %p816_p1  ;;  %p822_p12 = scmp.lt.s32.totalorder %s820_s8, %s814_s27 }
  0x5f   : > { %292 = vmatprep.subr.mxu0 %v891_v0  ;;  %622 = vmatpush3.msra.mxu1 %v372_v10  ;;  %v253_v27 = vld [vmem:[#allocation5 + $0x8] sm:$0xff]  ;;  %v363_v28 = vld [vmem:[#allocation7 + $0x20] sm:$0xff]  ;;  %v252_v29 = vld [vmem:[#allocation5] sm:$0xff] }
  0x60   : > { %293 = vmatpush1.msra.mxu0 %v263_v5  ;;  %623 = vmatprep.subr.mxu1 %v371_v12  ;;  %v269_v30 = vld [vmem:[#allocation5 + $0x88] sm:$0xff]  ;;  %v268_v31 = vld [vmem:[#allocation5 + $0x80] sm:$0xff]  ;;  %v251_v33 = vld [vmem:[%s1051_s13 + $0x18] sm:$0xff]  ;;  %p823_p7 = por %p822_p12, %p821_p6 }
  0x61   : > { %294 = vmatprep.subr.mxu0 %v891_v0  ;;  %624 = vmatpush3.msra.mxu1 %v371_v12  ;;  %v248_v32 = vld [vmem:[%s1051_s13] sm:$0xff]  ;;  %v250_v34 = vld [vmem:[%s1051_s13 + $0x10] sm:$0xff]  ;;  %v362_v35 = vld [vmem:[#allocation7 + $0x18] sm:$0xff] }
  0x62   : > { %295 = vmatpush1.msra.mxu0 %v262_v9  ;;  %625 = vmatprep.subr.mxu1 %v370_v14  ;;  %v361_v36 = vld [vmem:[#allocation7 + $0x10] sm:$0xff]  ;;  %v360_v37 = vld [vmem:[#allocation7 + $0x8] sm:$0xff]  ;;  %v359_v38 = vld [vmem:[#allocation7] sm:$0xff]  ;;  %p824_p9 = pnand %p823_p7, %p817_p2 }
  0x63   : > { %296 = vmatprep.subr.mxu0 %v891_v0  ;;  %626 = vmatpush3.msra.mxu1 %v370_v14  ;;  %v588_v39 = vld [vmem:[%s1140_s2] ss:$0 sm:$0xff] }
  0x64   : > { %297 = vmatpush1.msra.mxu0 %v261_v11  ;;  %627 = vmatprep.subr.mxu1 %v369_v16 }
  0x65   : > { %298 = vmatprep.subr.mxu0 %v891_v0  ;;  %628 = vmatpush3.msra.mxu1 %v369_v16 }
  0x66   : > { %299 = vmatpush1.msra.mxu0 %v260_v13  ;;  %629 = vmatprep.subr.mxu1 %v368_v18 }
  0x67   : > { %300 = vmatprep.subr.mxu0 %v891_v0  ;;  %630 = vmatpush3.msra.mxu1 %v368_v18 }
  0x68   : > { %301 = vmatpush1.msra.mxu0 %v259_v15  ;;  %631 = vmatprep.subr.mxu1 %v367_v20 }
  0x69   : > { %302 = vmatprep.subr.mxu0 %v891_v0  ;;  %632 = vmatpush3.msra.mxu1 %v367_v20 }
  0x6a   : > { %303 = vmatpush1.msra.mxu0 %v258_v17  ;;  %633 = vmatprep.subr.mxu1 %v366_v22 }
  0x6b   : > { %304 = vmatprep.subr.mxu0 %v891_v0  ;;  %634 = vmatpush3.msra.mxu1 %v366_v22 }
  0x6c   : > { %305 = vmatpush1.msra.mxu0 %v257_v19  ;;  %635 = vmatprep.subr.mxu1 %v365_v24 }
  0x6d   : > { %306 = vmatprep.subr.mxu0 %v891_v0  ;;  %636 = vmatpush3.msra.mxu1 %v365_v24 }
  0x6e   : > { %307 = vmatpush1.msra.mxu0 %v256_v21  ;;  %637 = vmatprep.subr.mxu1 %v364_v26 }
  0x6f   : > { %308 = vmatprep.subr.mxu0 %v891_v0  ;;  %638 = vmatpush3.msra.mxu1 %v364_v26 }
  0x70   : > { %309 = vmatpush1.msra.mxu0 %v255_v23  ;;  %639 = vmatprep.subr.mxu1 %v363_v28 }
  0x71   : > { %310 = vmatprep.subr.mxu0 %v891_v0  ;;  %640 = vmatpush3.msra.mxu1 %v363_v28 }
  0x72   : > { %311 = vmatpush1.msra.mxu0 %v254_v25  ;;  %641 = vmatprep.subr.mxu1 %v362_v35 }
  0x73   : > { %312 = vmatprep.subr.mxu0 %v891_v0  ;;  %642 = vmatpush3.msra.mxu1 %v362_v35 }
  0x74   : > { %313 = vmatpush1.msra.mxu0 %v253_v27  ;;  %643 = vmatprep.subr.mxu1 %v361_v36 }
  0x75   : > { %314 = vmatprep.subr.mxu0 %v891_v0  ;;  %644 = vmatpush3.msra.mxu1 %v361_v36 }
  0x76   : > { %315 = vmatpush1.msra.mxu0 %v252_v29  ;;  %645 = vmatprep.subr.mxu1 %v360_v37 }
  0x77   : > { %344 = vmatprep.subr.mxu0 %v891_v0  ;;  %646 = vmatpush3.msra.mxu1 %v360_v37 }
  0x78   : > { %345 = vmatpush2.msra.mxu0 %v269_v30  ;;  %647 = vmatprep.subr.mxu1 %v359_v38 }
  0x79   : > { %346 = vmatprep.subr.mxu0 %v891_v0  ;;  %648 = vmatpush3.msra.mxu1 %v359_v38 }
  0x7a   : > { %347 = vmatpush2.msra.mxu0 %v268_v31 }
  0x7b   : > { %349 = vmatmul.mubr.f32.vlgmr.msra.gmra.mxu0 %v248_v32 }
  0x7c   : > { %590 = vmatprep.mubr.msk.f32.mxu0 %vm277_vm0, %v251_v33 }
  0x7f   : > { %354 = vmatmul.mubr.f32.gmra.mxu0 %v250_v34 }
 0x13b   : > { %v350_v40 = vpop.f32.mrf.mxu0 }
 0x13c   : > { %v351_v41 = vadd.f32 %v588_v39, %v350_v40 }
 0x13d   : > { %v352_v42 = vpop.f32.mrf.mxu0 }
 0x13e   : > { %v375_v43 = vmul.f32 %v351_v41, %v351_v41 }
 0x13f   : > { %v355_v44 = vpop.f32.mrf.mxu0 }
 0x140   : > { %v356_v45 = vadd.f32 %v588_v39, %v355_v44  ;;  %649 = vmatprep.mubr.f32.mxu1 %v375_v43 }
 0x141   : > { %v357_v46 = vpop.f32.mrf.mxu0 }
 0x142   : > { %v376_v47 = vmul.f32 %v356_v45, %v356_v45 }
 0x144   : > { %650 = vmatmul.mubr.f32.vlgmr.msra.gmra.mxu1 %v376_v47 }
 0x204   : > { %v651_v48 = vpop.f32.mrf.mxu1 }
 0x205   : > { %v453_v49 = vadd.f32 1e-08, %v651_v48  ;;  %v461_v51 = vadd.f32 1.0, %v651_v48 }
 0x206   : > { %v443_v50 = vpop.f32.mrf.mxu1 }
 0x207   : > { %726 = vrsqrt.f32 %v453_v49  ;;  %v452_v52 = vadd.f32 1e-08, %v443_v50  ;;  %v460_v53 = vadd.f32 1.0, %v443_v50 }
 0x209   : > { %728 = vrsqrt.f32 %v452_v52 }
 0x20a   : > { %730 = vrcp.f32 %v461_v51 }
 0x20b   : > { %732 = vrcp.f32 %v460_v53 }
 0x214   : > { %v727_v54 = vpop.eup %726 }
 0x215   : > { %v457_v55 = vmul.f32 %v727_v54, %v651_v48 }
 0x216   : > { %v729_v56 = vpop.eup %728 }
 0x217   : > { %v459_v57 = vmul.f32 %v457_v55, %v356_v45  ;;  %v456_v58 = vmul.f32 %v729_v56, %v443_v50  ;;  %v731_v59 = vpop.eup %730 }
 0x218   : > { %v733_v62 = vpop.eup %732 }
 0x219   : > { %v465_v60 = vmul.f32 %v731_v59, %v459_v57  ;;  %v458_v61 = vmul.f32 %v456_v58, %v351_v41 }
 0x21b   : > { %467 = vst [vmem:[%s245_s6 + $0x8] sm:$0xff] %v465_v60  ;;  %v464_v63 = vmul.f32 %v733_v62, %v458_v61 }
 0x21d   : > { %466 = vst [vmem:[%s245_s6] sm:$0xff] %v464_v63 }
 0x21e   : > { %827 = shalt.err (!%p824_p9)
}
 0x21f   : > { %s828_s10 = scalar_lea.hbm %s1093_s26, 256  ;;  %s832_s21 = scalar_lea.hbm %s1142_s4, 512 }
 0x220   : > { %p829_p13 = scmp.ne.s32.totalorder %s1093_s26, %s828_s10  ;;  %p833_p4 = scmp.lt.s32.totalorder %s1093_s26, %s1142_s4 }
 0x221   : > { %p834_p8 = scmp.lt.s32.totalorder %s832_s21, %s828_s10 }
 0x222   : > { %p830_p5 = pnand %p829_p13, %p1158_p10 }
 0x223   : > { %p835_p3 = por %p834_p8, %p833_p4 }
 0x224   : > { %p831_p0 = pneg %p830_p5 }
 0x226   : > { %p836_p11 = pnand %p835_p3, %p831_p0 }
 0x228   : > { %839 = shalt.err (!%p836_p11)
}
 0x229   : > { %s893_s5 = smov 128   ;;  %s894_s6 = smov 8  }
 0x22a   : > { %662 = dma.vmem_to_hbm [thread:$0]  (%p1158_p10), %s1095_s7, 256, %s1093_s26, %s469_s19, %s893_s5, %s893_s5, %s894_s6  }
 0x22b PF: > { %s497_s25 = sand.u32 1, %s870_s15   ;;  %p1159_p1 = scmp.ne.s32.totalorder %s1148_s22, 0 }
 0x22c   : > { %p1160_p2 = scmp.ge.s32.totalorder %s882_s18, 2  ;;  %s498_s24 = scalar_lea.sflag [#allocation4], %s497_s25 }
 0x22e   : > { %p676_p6 = pnand %p1160_p2, %p1159_p1 }
 0x230   : > { %p677_p12 = pneg %p676_p6 }
 0x232   : > { %865 = dma.done.wait (%p677_p12), %s498_s24, 256  }
 0x233   : > { %867 = vsyncadd (%p677_p12), %s498_s24, 4294967040  ;;  %p18_p7 = scmp.ge.s32.totalorder %s992_s11, 4   ;;  %s1161_s15 = smov %s874_s16 }
 0x234   : > { %s1162_s16 = smov %s878_s17  ;;  %s1163_s17 = smov %s1008_s20 }
 0x235   : > { %s1164_s18 = smov %s992_s11  ;;  %20 = sbr.rel (!%p18_p7) target bundleno = 6 (0x6), region = 89 }
 0x23a   :  { %503 = vsyncpa [#allocation3], 1 }
 0x23b   :  { %505 = vsyncpa [#allocation3 + $0x1], 1 }
 0x23c   :  { %506 = vsyncpa [#allocation6], 1 }
 0x23d   :  { %507 = vsyncpa [#allocation4], 1 }
 0x23e   :  { %509 = vsyncpa [#allocation4 + $0x1], 1 }

</bundles_post_ra>
